<compile_context>
chip_gen: v5e
topology: v5e:2x2
jax: 0.10.0
libtpu: 0.0.40
codegen_flags: <defaults>
</compile_context>

<pallas_src>
import math

import jax
import jax.numpy as jnp
from jax.experimental import pallas as pl
from jax.experimental.pallas import tpu as pltpu

_MAX_TILE_BYTES = 4 * 1024 * 1024  # per-buffer VMEM budget (safe on v5e/v6e/v7x)


# ----------------------------------------------------------------------------
# Buffer construction (deterministic, mirrors __init__; shape [max_len, 1, D]).
# ----------------------------------------------------------------------------
def make_pe_table(d_model: int, max_len: int = 50) -> jnp.ndarray:
    """Builds the [max_len, 1, d_model] sinusoidal positional-encoding table (f32)."""
    if d_model % 2 != 0:
        raise ValueError("d_model must be even (same constraint as the PyTorch module)")
    position = jnp.arange(0, max_len, dtype=jnp.float32)[:, None]            # [L, 1]
    div_term = jnp.exp(
        jnp.arange(0, d_model, 2, dtype=jnp.float32) * (-math.log(10000.0) / d_model)
    )                                                                         # [D/2]
    pe = jnp.zeros((max_len, d_model), dtype=jnp.float32)
    pe = pe.at[:, 0::2].set(jnp.sin(position * div_term))
    pe = pe.at[:, 1::2].set(jnp.cos(position * div_term))
    return pe[:, None, :]                                                     # [L, 1, D]


# ----------------------------------------------------------------------------
# Pallas kernel: one (tS, B, D) activation slab + its (tS, 1, D) pe tile.
# ----------------------------------------------------------------------------
def pe_add_kernel(x_ref, pe_ref, o_ref):
    # x_ref/o_ref: (tS, B, D); pe_ref: (tS, 1, D) f32 -- broadcast over batch dim.
    x = x_ref[...].astype(jnp.float32)
    o_ref[...] = (x + pe_ref[...]).astype(o_ref.dtype)


def _positional_encoding_forward(x: jnp.ndarray, pe_table: jnp.ndarray) -> jnp.ndarray:
    """x: [S, B, D]; pe_table: [max_len, 1, D]. Returns x + pe (dropout = eval identity)."""
    S, B, D = x.shape
    max_len, _, d_model = pe_table.shape
    if D != d_model:
        raise ValueError(f"d_model mismatch: x has {D}, pe table has {d_model}")
    if S > max_len:
        raise ValueError(f"sequence length {S} exceeds pe table max_len {max_len}")

    # Seq-tile size: as many seq positions as fit the per-buffer VMEM budget,
    # but keep >= 2 grid steps when possible so v7x's 2 TensorCores both work.
    itemsize = jnp.dtype(x.dtype).itemsize
    slab_bytes = max(B * D * itemsize, 1)          # one seq position's slab
    rows_budget = max(1, _MAX_TILE_BYTES // slab_bytes)
    tS = min(S, rows_budget)
    if S >= 2 and pl.cdiv(S, tS) < 2:
        tS = (S + 1) // 2
    grid = (pl.cdiv(S, tS),)

    return pl.pallas_call(
        pe_add_kernel,
        out_shape=jax.ShapeDtypeStruct((S, B, D), x.dtype),
        grid=grid,
        in_specs=[
            pl.BlockSpec((tS, B, D), lambda i: (i, 0, 0)),   # native layout, no transpose
            pl.BlockSpec((tS, 1, D), lambda i: (i, 0, 0)),   # pe tile, read once total
        ],
        out_specs=pl.BlockSpec((tS, B, D), lambda i: (i, 0, 0)),
        input_output_aliases={0: 0},                          # in-place on the donated x
        compiler_params=pltpu.CompilerParams(
            dimension_semantics=("parallel",),
        ),
    )(x, pe_table.astype(jnp.float32))


positional_encoding_forward = jax.jit(_positional_encoding_forward, donate_argnums=(0,))


# ----------------------------------------------------------------------------
# Smoke test
# ----------------------------------------------------------------------------
if __name__ == "__main__":
    d_model = 32
    max_len = 50
    seq_len = 8
    batch = 2

    key = jax.random.PRNGKey(0)
    x = jax.random.normal(key, (seq_len, batch, d_model), dtype=jnp.float32)
    pe_table = make_pe_table(d_model, max_len)

    # Reference (same math as the PyTorch forward in eval mode); computed
    # BEFORE the kernel call because x's buffer is donated to the kernel.
    ref = x + pe_table[:seq_len, :]

    out = positional_encoding_forward(x, pe_table)
    out = jax.block_until_ready(out)

    assert out.shape == (seq_len, batch, d_model)
    assert jnp.allclose(out, ref, atol=1e-6), "mismatch vs reference"

    print("KERNEL_OK")
</pallas_src>

<mosaic_0001>
module attributes {stable_mosaic.version = 11 : i64} {
  func.func @pe_add_kernel(%arg0: i32, %arg1: memref<4x2x32xf32, #tpu.memory_space<vmem>>, %arg2: memref<4x1x32xf32, #tpu.memory_space<vmem>>, %arg3: memref<4x2x32xf32, #tpu.memory_space<vmem>>) attributes {dimension_semantics = [#tpu.dimension_semantics<parallel>], iteration_bounds = array<i64: 2>, scalar_prefetch = 0 : i64, scratch_operands = 0 : i64, tpu.core_type = #tpu.core_type<tc>, window_params = [{transform_indices = @transform_0, window_bounds = array<i64: 4, 2, 32>}, {transform_indices = @transform_1, window_bounds = array<i64: 4, 1, 32>}, {transform_indices = @transform_2, window_bounds = array<i64: 4, 2, 32>}]} {
    %c0 = arith.constant 0 : index
    %c0_0 = arith.constant 0 : index
    %c0_1 = arith.constant 0 : index
    %0 = vector.load %arg1[%c0, %c0_0, %c0_1] : memref<4x2x32xf32, #tpu.memory_space<vmem>>, vector<4x2x32xf32>
    %c0_2 = arith.constant 0 : index
    %c0_3 = arith.constant 0 : index
    %c0_4 = arith.constant 0 : index
    %1 = vector.load %arg2[%c0_2, %c0_3, %c0_4] : memref<4x1x32xf32, #tpu.memory_space<vmem>>, vector<4x1x32xf32>
    %2 = vector.broadcast %1 : vector<4x1x32xf32> to vector<4x2x32xf32>
    %3 = arith.addf %0, %2 : vector<4x2x32xf32>
    %c0_5 = arith.constant 0 : index
    %c0_6 = arith.constant 0 : index
    %c0_7 = arith.constant 0 : index
    %4 = vector.load %arg3[%c0_5, %c0_6, %c0_7] : memref<4x2x32xf32, #tpu.memory_space<vmem>>, vector<4x2x32xf32>
    tpu.vector_store %arg3[%c0_5, %c0_6, %c0_7], %3 {strides = array<i32>} : memref<4x2x32xf32, #tpu.memory_space<vmem>>, vector<4x2x32xf32>,
    return
  }
  func.func @transform_0(%arg0: i32) -> (i32, i32, i32) {
    %c0_i32 = arith.constant 0 : i32
    %c0_i32_0 = arith.constant 0 : i32
    %c0_i32_1 = arith.constant 0 : i32
    return %arg0, %c0_i32, %c0_i32_0 : i32, i32, i32
  }
  func.func @transform_1(%arg0: i32) -> (i32, i32, i32) {
    %c0_i32 = arith.constant 0 : i32
    %c0_i32_0 = arith.constant 0 : i32
    %c0_i32_1 = arith.constant 0 : i32
    return %arg0, %c0_i32, %c0_i32_0 : i32, i32, i32
  }
  func.func @transform_2(%arg0: i32) -> (i32, i32, i32) {
    %c0_i32 = arith.constant 0 : i32
    %c0_i32_0 = arith.constant 0 : i32
    %c0_i32_1 = arith.constant 0 : i32
    return %arg0, %c0_i32, %c0_i32_0 : i32, i32, i32
  }
}

</mosaic_0001>

<bundles_post_ra>
// kernel: _positional_encoding_forward.1
= control target key start
LH: loop header
LB: loop body
LE: loop exit
PB: predicated region body
PF: predicated region fallthrough
CT: control target
= control target key end

     0   :  { %7 = vsyncpa [#allocation3], 0  ;;  %s653_s0 = inlined_call_operand.hbm [shape: f32[8,2,32], index: 0, kind: input, shape index: {}, may-alias: {0,2}]   ;;  %s654_s1 = inlined_call_operand.vmem [shape: f32[50,1,32], index: 1, kind: input, shape index: {}]   ;;  %s655_s2 = inlined_call_operand.hbm [shape: f32[8,2,32], index: 2, kind: output, shape index: {}, may-alias: {0,2}]  }
   0x1   :  { %9 = vsyncpa [#allocation3 + $0x1], 0 }
   0x2   :  { %10 = vsyncpa [#allocation4], 0 }
   0x3   :  { %12 = vsyncpa [#allocation4 + $0x1], 0  ;;  %s515_s9 = smov 0   ;;  %s517_s10 = smov 0  }
   0x4   :  { %s519_s11 = smov 0   ;;  %s521_s12 = smov 0  }
   0x5 LB: > { %s536_s13 = sadd.s32 4294967295, %s494_s12   ;;  %s327_s14 = sadd.s32 4294967294, %s494_s12   ;;  %s494_s12 = sphi %s521_s12, %s665_s12   ;;  %s490_s11 = sphi %s519_s11, %s664_s11   ;;  %s486_s10 = sphi %s517_s10, %s663_s10   ;;  %s482_s9 = sphi %s515_s9, %s662_s9  }
   0x6   : > { %s540_s15 = sadd.s32 1, %s494_s12   ;;  %s25_s16 = sadd.s32 1, %s490_s11 }
   0x7   : > { %s22_s17 = ssub.s32 %s494_s12, %s540_s15  ;;  %p32_p0 = scmp.ne.s32.totalorder %s490_s11, %s486_s10 }
   0x8   : > { %p23_p1 = scmp.eq.s32.totalorder %s22_s17, 0  ;;  %p33_p2 = scmp.eq.s32.totalorder %s494_s12, 0 }
   0x9   : > { %p38_p3 = scmp.ne.s32.totalorder %s486_s10, %s482_s9  ;;  %p39_p4 = scmp.eq.s32.totalorder %s536_s13, 0 }
   0xa   : > { %s552_s18 = scalar_select %p23_p1, %s490_s11, %s25_s16  }
   0xb   : > { %p554_p5 = por %p33_p2, %p32_p0  ;;  %p558_p6 = por %p39_p4, %p38_p3 }
   0xc   : > { %p88_p7 = scmp.eq.s32.totalorder %s536_s13, 1  ;;  %p94_p8 = scmp.eq.s32.totalorder %s327_s14, 1 }
   0xd   : > { %p356_p10 = scmp.lt.s32.totalorder %s494_s12, 2  ;;  %s114_s23 = sand.u32 1, %s490_s11  }
   0xe   : > { %p565_p11 = por %p88_p7, %p32_p0  ;;  %p569_p12 = por %p94_p8, %p38_p3 }
   0xf   : > { %s342_s24 = sshll.u32 %s494_s12, 3  ;;  %s330_s25 = sshll.u32 %s114_s23, 3 }
  0x10   : > { %s123_s28 = scalar_lea.hbm %s653_s0, %s342_s24  ;;  %s118_s30 = scalar_lea.vmem [#allocation2], %s330_s25 }
  0x11   : > { %s124_s29 = sshll.u32 %s123_s28, 4  ;;  %s126_s3 = sshll.u32 %s118_s30, 4  ;;  %s125_s29 = int_to_ptr.hbm [resolvable:$true] %s124_s29  ;;  %s127_s3 = int_to_ptr.vmem [resolvable:$true] %s126_s3 }
  0x12   : > { %p580_p13 = pnand %p356_p10, %p554_p5  ;;  %p333_p0 = scmp.ge.s32.totalorder %s494_s12, 1 }
  0x13   : > { %p148_p1 = scmp.lt.s32.totalorder %s494_s12, 3  ;;  %s115_s5 = scalar_lea.sflag [#allocation3], %s114_s23 }
  0x14   : > { %s398_s6 = sshra.s32 %s125_s29, 4  ;;  %p402_p3 = pneg %p580_p13  ;;  %s399_s6 = int_to_ptr.hbm [resolvable:$true] %s398_s6 }
  0x15   : > { %s400_s7 = scalar_lea.hbm %s399_s6, 8  ;;  %s405_s16 = scalar_lea.hbm %s653_s0, 16 }
  0x16   : > { %p401_p2 = scmp.ne.s32.totalorder %s399_s6, %s400_s7  ;;  %p406_p5 = scmp.lt.s32.totalorder %s399_s6, %s653_s0 }
  0x17   : > { %p407_p8 = scmp.lt.s32.totalorder %s405_s16, %s400_s7 }
  0x18   : > { %p403_p4 = pnand %p402_p3, %p401_p2 }
  0x19   : > { %p408_p10 = por %p407_p8, %p406_p5 }
  0x1a   : > { %p404_p7 = pneg %p403_p4 }
  0x1c   : > { %p409_p9 = pnand %p408_p10, %p404_p7 }
  0x1e   : > { %412 = shalt.err (!%p409_p9)
}
  0x1f   : > { %s496_s23 = smov 32   ;;  %s497_s24 = smov 2  }
  0x20   : > { %351 = dma.hbm_to_vmem [thread:$0]  (!%p580_p13), %s125_s29, 128, %s127_s3, %s115_s5, %s496_s23, %s496_s23, %s497_s24  }
  0x21   : > { %p149_p2 = pnand %p333_p0, %p148_p1 }
  0x22   : > { %s601_s25 = sand.u32 (!%p149_p2), 1, %s486_s10  }
  0x23   : > { %152 = sbr.rel (%p149_p2) target bundleno = 60 (0x3c), region = 28  ;;  %s334_s26 = sshll.u32 (!%p149_p2), %s601_s25, 3 }
  0x24   : > { %s155_s27 = scalar_lea.sflag (!%p149_p2), [#allocation3], %s601_s25  ;;  %s158_s28 = scalar_lea.vmem (!%p149_p2), [#allocation2], %s334_s26 }
  0x28   : > { %473 = dma.done.wait (%p558_p6), %s155_s27, 128  }
  0x29   : > { %475 = vsyncadd (%p558_p6), %s155_s27, 4294967168  ;;  %s336_s29 = sshll.u32 %s536_s13, 2  ;;  %s343_s30 = sshll.u32 %s536_s13, 3  ;;  %vm224_vm0 = vcmask 254976   ;;  %v200_v0 = vld [vmem:[%s158_s28] sm:$0x3] }
  0x2a   : > { %p192_p9 = scmp.lt.s32.totalorder %s336_s29, 49  ;;  %s241_s8 = scalar_lea.hbm %s655_s2, %s343_s30  ;;  %v201_v2 = vld [vmem:[%s158_s28 + $0x2] sm:$0x3]  ;;  %v202_v5 = vld [vmem:[%s158_s28 + $0x4] sm:$0x3] }
  0x2b   : > { %s186_s14 = scalar_lea.vmem [#allocation5], %s334_s26  ;;  %s244_s17 = sshll.u32 %s241_s8, 4  ;;  %v203_v8 = vld [vmem:[%s158_s28 + $0x6] sm:$0x3]  ;;  %s245_s17 = int_to_ptr.hbm [resolvable:$true] %s244_s17 }
  0x2c   : > { %s667_s29 = smov (!%p192_p9, %s336_s29), 49  ;;  %s242_s16 = sshll.u32 %s186_s14, 4  ;;  %s617_s16 = int_to_ptr.vmem [resolvable:$true] %s242_s16 }
  0x2d   : > { %s194_s5 = scalar_lea.vmem %s654_s1, %s667_s29  ;;  %s230_s13 = scalar_lea.sflag [#allocation4], %s601_s25 }
  0x2e   : > { %v394_v1 = vld [vmem:[%s194_s5] ss:$0 sm:$0xff]  ;;  %v395_v3 = vld [vmem:[%s194_s5 + $0x1] ss:$0 sm:$0xff]  ;;  %v396_v6 = vld [vmem:[%s194_s5 + $0x2] ss:$0 sm:$0xff] }
  0x2f   : > { %v220_v4 = vadd.f32 %v394_v1, %v200_v0  ;;  %v221_v7 = vadd.f32 %v395_v3, %v201_v2  ;;  %v397_v9 = vld [vmem:[%s194_s5 + $0x3] ss:$0 sm:$0xff]  ;;  %v222_v10 = vadd.f32 %v396_v6, %v202_v5  ;;  %s442_s20 = sshra.s32 %s245_s17, 4  ;;  %s448_s26 = scalar_lea.hbm %s655_s2, 16  ;;  %s443_s20 = int_to_ptr.hbm [resolvable:$true] %s442_s20 }
  0x30   : > { %v223_v11 = vadd.f32 %v397_v9, %v203_v8  ;;  %s444_s19 = scalar_lea.hbm %s443_s20, 8  ;;  %p449_p1 = scmp.lt.s32.totalorder %s443_s20, %s655_s2 }
  0x31   : > { %225 = vst.msk [vmem:[%s186_s14] sm:$0x3] %vm224_vm0, %v220_v4  ;;  %p445_p6 = scmp.ne.s32.totalorder %s443_s20, %s444_s19  ;;  %p450_p3 = scmp.lt.s32.totalorder %s448_s26, %s444_s19 }
  0x32   : > { %226 = vst.msk [vmem:[%s186_s14 + $0x2] sm:$0x3] %vm224_vm0, %v221_v7 }
  0x33   : > { %227 = vst.msk [vmem:[%s186_s14 + $0x4] sm:$0x3] %vm224_vm0, %v222_v10  ;;  %p446_p13 = pnand %p445_p6, %p565_p11  ;;  %p451_p4 = por %p450_p3, %p449_p1 }
  0x34   : > { %228 = vst.msk [vmem:[%s186_s14 + $0x6] sm:$0x3] %vm224_vm0, %v223_v11 }
  0x35   : > { %p447_p0 = pneg %p446_p13 }
  0x37   : > { %p452_p7 = pnand %p451_p4, %p447_p0 }
  0x39   : > { %455 = shalt.err (!%p452_p7)
}
  0x3a   : > { %s498_s25 = smov 32   ;;  %s499_s29 = smov 2  }
  0x3b   : > { %346 = dma.vmem_to_hbm [thread:$0]  (%p565_p11), %s617_s16, 128, %s245_s17, %s230_s13, %s498_s25, %s498_s25, %s499_s29  }
  0x3c PF: > { %s259_s30 = sand.u32 1, %s482_s9   ;;  %p661_p5 = scmp.ge.s32.totalorder %s494_s12, 2 }
  0x3d   : > { %s260_s3 = scalar_lea.sflag [#allocation4], %s259_s30 }
  0x3e   : > { %p353_p8 = pnand %p661_p5, %p569_p12 }
  0x40   : > { %p354_p10 = pneg %p353_p8 }
  0x42   : > { %477 = dma.done.wait (%p354_p10), %s260_s3, 128  }
  0x43   : > { %479 = vsyncadd (%p354_p10), %s260_s3, 4294967168  ;;  %p15_p2 = scmp.ge.s32.totalorder %s540_s15, 4   ;;  %s662_s9 = smov %s486_s10 }
  0x44   : > { %s663_s10 = smov %s490_s11  ;;  %s664_s11 = smov %s552_s18 }
  0x45   : > { %s665_s12 = smov %s540_s15  ;;  %17 = sbr.rel (!%p15_p2) target bundleno = 5 (0x5), region = 76 }
  0x4a   :  { %266 = vsyncpa [#allocation3], 1 }
  0x4b   :  { %268 = vsyncpa [#allocation3 + $0x1], 1 }
  0x4c   :  { %269 = vsyncpa [#allocation4], 1 }
  0x4d   :  { %271 = vsyncpa [#allocation4 + $0x1], 1 }

</bundles_post_ra>
